<compile_context>
chip_gen: v6e
topology: v6e:2x2x1
jax: 0.10.0
libtpu: 0.0.40
codegen_flags: <defaults>
</compile_context>

<pallas_src>
import functools
import math

import jax
import jax.numpy as jnp
from jax.experimental import pallas as pl
from jax.experimental.pallas import tpu as pltpu

LN_EPS = 1e-6   # partial(nn.LayerNorm, eps=1e-6)
BN_EPS = 1e-5   # nn.BatchNorm1d default

ROW_TILE_TARGET = 256           # fills v6e/v7x 256x256 MXU, v5e 128x128
VMEM_LIMIT = 32 * 1024 * 1024   # conservative scoped-VMEM budget, safe on v5e/v6e/v7x


def _pick_row_tile(m, target=ROW_TILE_TARGET):
    if m >= target:
        return target
    return max(8, ((m + 7) // 8) * 8)


def _round_up(m, t):
    return ((m + t - 1) // t) * t


def _row_spec(tr, c):
    return pl.BlockSpec((tr, c), lambda i: (i, 0))


def _const_spec(shape):
    # grid-invariant operand: constant block index -> fetched once, kept resident
    return pl.BlockSpec(shape, lambda i: (0,) * len(shape))


# ----------------------------- Pallas kernels ------------------------------ #

def _matmul_bias_kernel(x_ref, w_ref, b_ref, o_ref):
    # patch embedding: flattened patches (bf16) @ conv-weight^T (bf16) + bias, f32 accum
    o_ref[...] = (jnp.dot(x_ref[...], w_ref[...],
                          preferred_element_type=jnp.float32) + b_ref[...])


def _ln_kernel(x_ref, g_ref, b_ref, o_ref):
    x = x_ref[...]
    mu = jnp.mean(x, axis=-1, keepdims=True)
    var = jnp.mean((x - mu) ** 2, axis=-1, keepdims=True)
    o_ref[...] = (x - mu) * jax.lax.rsqrt(var + LN_EPS) * g_ref[...] + b_ref[...]


def _mlp_residual_ln_kernel(res_ref, f_ref, g2_ref, b2_ref,
                            w1_ref, bb1_ref, w2_ref, bb2_ref,
                            gn_ref, bn_ref, tok_ref, lnn_ref):
    # tok = residual + fc2(gelu(fc1(LN2(filter_out))))   (GFNet block, post-filter half)
    # lnn = LayerNorm(tok) using the *next* block's LN1 params (or the final norm params),
    #       fusing the LN that would otherwise re-read tok from HBM.
    f = f_ref[...]
    mu = jnp.mean(f, axis=-1, keepdims=True)
    var = jnp.mean((f - mu) ** 2, axis=-1, keepdims=True)
    h = (f - mu) * jax.lax.rsqrt(var + LN_EPS) * g2_ref[...] + b2_ref[...]
    h = jnp.dot(h.astype(jnp.bfloat16), w1_ref[...],
                preferred_element_type=jnp.float32) + bb1_ref[...]
    # TODO(synk): PyTorch nn.GELU defaults to the exact erf form; the tanh approximation
    # is used in-kernel (EUP-supported transcendental).
    h = jax.nn.gelu(h, approximate=True)
    h = jnp.dot(h.astype(jnp.bfloat16), w2_ref[...],
                preferred_element_type=jnp.float32) + bb2_ref[...]
    tok = res_ref[...] + h
    tok_ref[...] = tok
    mu2 = jnp.mean(tok, axis=-1, keepdims=True)
    var2 = jnp.mean((tok - mu2) ** 2, axis=-1, keepdims=True)
    lnn_ref[...] = (tok - mu2) * jax.lax.rsqrt(var2 + LN_EPS) * gn_ref[...] + bn_ref[...]


def _head_kernel(t_ref, bnw_ref, bnb_ref, rm_ref, rv_ref, gfeat_ref, feat_ref):
    # token mean -> BatchNorm1d (eval / running stats); final LN already fused upstream
    gfeat = jnp.mean(t_ref[...], axis=1)                       # (tb, C)
    gfeat_ref[...] = gfeat
    feat_ref[...] = ((gfeat - rm_ref[...]) * jax.lax.rsqrt(rv_ref[...] + BN_EPS)
                     * bnw_ref[...] + bnb_ref[...])


# --------------------------- pallas_call wrappers --------------------------- #

def patch_embed_matmul(patches2d, w, b, *, tr):
    M, K = patches2d.shape
    E = w.shape[1]
    assert M % tr == 0
    return pl.pallas_call(
        _matmul_bias_kernel,
        out_shape=jax.ShapeDtypeStruct((M, E), jnp.float32),
        grid=(M // tr,),
        in_specs=[pl.BlockSpec((tr, K), lambda i: (i, 0)),
                  _const_spec((K, E)),
                  _const_spec((1, E))],
        out_specs=_row_spec(tr, E),
        compiler_params=pltpu.CompilerParams(
            dimension_semantics=("parallel",), vmem_limit_bytes=VMEM_LIMIT),
    )(patches2d, w, b.reshape(1, E))


def layernorm_rows(x2d, gamma, beta, *, tr):
    M, C = x2d.shape
    assert M % tr == 0
    return pl.pallas_call(
        _ln_kernel,
        out_shape=jax.ShapeDtypeStruct((M, C), jnp.float32),
        grid=(M // tr,),
        in_specs=[_row_spec(tr, C), _const_spec((1, C)), _const_spec((1, C))],
        out_specs=_row_spec(tr, C),
        compiler_params=pltpu.CompilerParams(
            dimension_semantics=("parallel",), vmem_limit_bytes=VMEM_LIMIT),
    )(x2d, gamma.reshape(1, C), beta.reshape(1, C))


def mlp_residual_ln(res2d, f2d, ln2_g, ln2_b, w1, b1, w2, b2,
                    ln_next_g, ln_next_b, *, tr):
    M, C = res2d.shape
    H = w1.shape[1]
    assert M % tr == 0
    row = _row_spec(tr, C)
    return pl.pallas_call(
        _mlp_residual_ln_kernel,
        out_shape=(jax.ShapeDtypeStruct((M, C), jnp.float32),   # new tokens (residual stream)
                   jax.ShapeDtypeStruct((M, C), jnp.float32)),  # fused LN of new tokens
        grid=(M // tr,),
        in_specs=[row, row,
                  _const_spec((1, C)), _const_spec((1, C)),
                  _const_spec((C, H)), _const_spec((1, H)),
                  _const_spec((H, C)), _const_spec((1, C)),
                  _const_spec((1, C)), _const_spec((1, C))],
        out_specs=(row, row),
        input_output_aliases={0: 0},   # residual input buffer is dead after the call
        compiler_params=pltpu.CompilerParams(
            dimension_semantics=("parallel",), vmem_limit_bytes=VMEM_LIMIT),
    )(res2d, f2d, ln2_g.reshape(1, C), ln2_b.reshape(1, C),
      w1, b1.reshape(1, H), w2, b2.reshape(1, C),
      ln_next_g.reshape(1, C), ln_next_b.reshape(1, C))


def head(ln_tokens, bn_w, bn_b, bn_rm, bn_rv):
    B, N, C = ln_tokens.shape
    tb = math.gcd(B, 8)   # batch tile (divides B exactly; pipelines / megacore-shards large B)
    return pl.pallas_call(
        _head_kernel,
        out_shape=(jax.ShapeDtypeStruct((B, C), jnp.float32),   # global_feat
                   jax.ShapeDtypeStruct((B, C), jnp.float32)),  # feat (after BN)
        grid=(B // tb,),
        in_specs=[pl.BlockSpec((tb, N, C), lambda i: (i, 0, 0)),
                  _const_spec((1, C)), _const_spec((1, C)),
                  _const_spec((1, C)), _const_spec((1, C))],
        out_specs=(pl.BlockSpec((tb, C), lambda i: (i, 0)),
                   pl.BlockSpec((tb, C), lambda i: (i, 0))),
        compiler_params=pltpu.CompilerParams(
            dimension_semantics=("parallel",), vmem_limit_bytes=VMEM_LIMIT),
    )(ln_tokens, bn_w.reshape(1, C), bn_b.reshape(1, C),
      bn_rm.reshape(1, C), bn_rv.reshape(1, C))


# ------------------------------ JAX glue ----------------------------------- #

def extract_patches(x, p):
    # x: (B, C_in, H, W) NCHW  ->  (B, N, C_in*p*p) ordered like Conv2d(stride=p).flatten(2).T
    B, Cin, H, W = x.shape
    a, b = H // p, W // p
    xp = x.reshape(B, Cin, a, p, b, p)
    xp = xp.transpose(0, 2, 4, 1, 3, 5)          # (B, a, b, Cin, p, p)
    return xp.reshape(B, a * b, Cin * p * p), a, b


def global_filter(x, cw, a, b):
    # GlobalFilter: rfft2 -> complex weight multiply -> irfft2
    # TODO(synk): no Pallas FFT primitive on TPU; done with jnp.fft (XLA FFT custom call).
    B, N, C = x.shape
    xr = x.reshape(B, a, b, C).astype(jnp.float32)
    X = jnp.fft.rfft2(xr, axes=(1, 2), norm="ortho")
    w = cw[..., 0] + 1j * cw[..., 1]             # (a, b//2+1, C)
    y = jnp.fft.irfft2(X * w[None], s=(a, b), axes=(1, 2), norm="ortho")
    return y.reshape(B, N, C).astype(jnp.float32)


def gfnet_reid_forward(x, params):
    """Eval forward of build_gfnet (GFNet-B backbone). Returns (feat, global_feat);
    feat is the module's return value for NECK_FEAT='after'."""
    p = params
    B = x.shape[0]
    patches, a, b = extract_patches(x, p["patch_size"])
    _, N, K = patches.shape
    E = p["proj_w"].shape[1]

    M = B * N
    tr = _pick_row_tile(M)
    Mp = _round_up(M, tr)
    pad = Mp - M

    def pad_rows(x2d):
        return jnp.pad(x2d, ((0, pad), (0, 0))) if pad else x2d

    # patch embedding (bf16 MXU GEMM, f32 accumulate) + positional embedding
    flat = pad_rows(patches.reshape(M, K).astype(jnp.bfloat16))
    tok = patch_embed_matmul(flat, p["proj_w"], p["proj_b"], tr=tr)       # (Mp, E) f32
    tok = tok[:M].reshape(B, N, E) + p["pos_embed"]
    tok_p = pad_rows(tok.reshape(M, E))                                   # padded residual stream

    blocks = p["blocks"]
    # LN1 of block 0; subsequent LN1s (and the final norm) are fused into the MLP kernel.
    ln = layernorm_rows(tok_p, blocks[0]["ln1_g"], blocks[0]["ln1_b"], tr=tr)

    for k, blk in enumerate(blocks):
        f = global_filter(ln[:M].reshape(B, N, E), blk["filter_w"], a, b)
        f_p = pad_rows(f.reshape(M, E))
        if k + 1 < len(blocks):
            gnext, bnext = blocks[k + 1]["ln1_g"], blocks[k + 1]["ln1_b"]
        else:
            gnext, bnext = p["norm_g"], p["norm_b"]   # fuse the final LayerNorm
        tok_p, ln = mlp_residual_ln(tok_p, f_p,
                                    blk["ln2_g"], blk["ln2_b"],
                                    blk["fc1_w"], blk["fc1_b"],
                                    blk["fc2_w"], blk["fc2_b"],
                                    gnext, bnext, tr=tr)

    # `ln` now holds LayerNorm_final(tokens); head = token mean + BatchNorm1d (eval stats)
    global_feat, feat = head(ln[:M].reshape(B, N, E),
                             p["bn_w"], p["bn_b"], p["bn_rm"], p["bn_rv"])
    # self.training == False and cfg.TEST.NECK_FEAT == 'after'  ->  module returns feat
    return feat, global_feat


# ------------------------- deterministic parameters ------------------------- #

def init_params(key, *, img_size=16, patch_size=4, in_chans=3, embed_dim=32,
                depth=2, mlp_ratio=4, num_classes=8):
    a = b = img_size // patch_size
    N = a * b
    wfreq = b // 2 + 1
    hidden = embed_dim * mlp_ratio
    keys = iter(jax.random.split(key, 3 + 3 * depth))

    params = {"patch_size": patch_size}
    # PatchEmbed Conv2d(in_chans, embed_dim, k=p, stride=p): weight (E, Cin, p, p), bias (E,)
    conv_w = jax.random.normal(next(keys), (embed_dim, in_chans, patch_size, patch_size)) * 0.02
    params["proj_w"] = conv_w.reshape(embed_dim, -1).T.astype(jnp.bfloat16)   # (K, E) bf16
    params["proj_b"] = jnp.zeros((1, embed_dim), jnp.float32)
    params["pos_embed"] = (jax.random.normal(next(keys), (1, N, embed_dim)) * 0.02
                           ).astype(jnp.float32)

    blocks = []
    for _ in range(depth):
        blk = {
            "ln1_g": jnp.ones((embed_dim,), jnp.float32),
            "ln1_b": jnp.zeros((embed_dim,), jnp.float32),
            # GlobalFilter.complex_weight: (h, w//2+1, dim, 2) ~ randn*0.02
            "filter_w": (jax.random.normal(next(keys), (a, wfreq, embed_dim, 2)) * 0.02
                         ).astype(jnp.float32),
            "ln2_g": jnp.ones((embed_dim,), jnp.float32),
            "ln2_b": jnp.zeros((embed_dim,), jnp.float32),
            "fc1_w": (jax.random.normal(next(keys), (hidden, embed_dim)) * 0.02
                      ).T.astype(jnp.bfloat16),                               # (E, H) bf16
            "fc1_b": jnp.zeros((1, hidden), jnp.float32),
            "fc2_w": (jax.random.normal(next(keys), (embed_dim, hidden)) * 0.02
                      ).T.astype(jnp.bfloat16),                               # (H, E) bf16
            "fc2_b": jnp.zeros((1, embed_dim), jnp.float32),
        }
        blocks.append(blk)
    params["blocks"] = blocks

    params["norm_g"] = jnp.ones((embed_dim,), jnp.float32)
    params["norm_b"] = jnp.zeros((embed_dim,), jnp.float32)
    # bottleneck BatchNorm1d (kaiming init: weight=1, bias=0; fresh running stats)
    params["bn_w"] = jnp.ones((embed_dim,), jnp.float32)
    params["bn_b"] = jnp.zeros((embed_dim,), jnp.float32)
    params["bn_rm"] = jnp.zeros((embed_dim,), jnp.float32)
    params["bn_rv"] = jnp.ones((embed_dim,), jnp.float32)
    # classifier Linear(E, num_classes, bias=False), std=0.001 — unused in eval forward
    params["cls_w"] = (jax.random.normal(next(keys), (num_classes, embed_dim)) * 0.001
                       ).astype(jnp.float32)
    return params


if __name__ == "__main__":
    key = jax.random.PRNGKey(0)
    pkey, xkey = jax.random.split(key)
    params = init_params(pkey, img_size=16, patch_size=4, in_chans=3,
                         embed_dim=32, depth=2, mlp_ratio=4, num_classes=8)
    x = jax.random.normal(xkey, (2, 3, 16, 16), dtype=jnp.float32)  # NCHW, like PyTorch

    fwd = jax.jit(functools.partial(gfnet_reid_forward, params=params))
    feat, global_feat = fwd(x)
    jax.block_until_ready((feat, global_feat))

    assert feat.shape == (2, 32) and global_feat.shape == (2, 32)
    assert bool(jnp.isfinite(feat).all()) and bool(jnp.isfinite(global_feat).all())
    print("KERNEL_OK")
</pallas_src>

<mosaic_0001>
module attributes {stable_mosaic.version = 11 : i64} {
  func.func @_matmul_bias_kernel(%arg0: i32, %arg1: memref<32x48xbf16, #tpu.memory_space<vmem>>, %arg2: memref<48x32xbf16, #tpu.memory_space<vmem>>, %arg3: memref<1x32xf32, #tpu.memory_space<vmem>>, %arg4: memref<32x32xf32, #tpu.memory_space<vmem>>) attributes {dimension_semantics = [#tpu.dimension_semantics<parallel>], iteration_bounds = array<i64: 1>, scalar_prefetch = 0 : i64, scratch_operands = 0 : i64, tpu.core_type = #tpu.core_type<tc>, window_params = [{transform_indices = @transform_0, window_bounds = array<i64: 32, 48>}, {pipeline_mode = #tpu.pipeline_mode<synchronous>, transform_indices = @transform_1, window_bounds = array<i64: 48, 32>}, {pipeline_mode = #tpu.pipeline_mode<synchronous>, transform_indices = @transform_2, window_bounds = array<i64: 1, 32>}, {transform_indices = @transform_3, window_bounds = array<i64: 32, 32>}]} {
    %c0 = arith.constant 0 : index
    %c0_0 = arith.constant 0 : index
    %0 = vector.load %arg1[%c0, %c0_0] : memref<32x48xbf16, #tpu.memory_space<vmem>>, vector<32x48xbf16>
    %c0_1 = arith.constant 0 : index
    %c0_2 = arith.constant 0 : index
    %1 = vector.load %arg2[%c0_1, %c0_2] : memref<48x32xbf16, #tpu.memory_space<vmem>>, vector<48x32xbf16>
    %cst = arith.constant dense<0.000000e+00> : vector<32x32xf32>
    %2 = tpu.matmul %0, %1, %cst {dimension_numbers = #tpu.dot_dimension_numbers<[1], [0], [0], [1], [0, 0, 1, 1], [], []>} : vector<32x48xbf16>, vector<48x32xbf16>, vector<32x32xf32> -> vector<32x32xf32>
    %c0_3 = arith.constant 0 : index
    %c0_4 = arith.constant 0 : index
    %3 = vector.load %arg3[%c0_3, %c0_4] : memref<1x32xf32, #tpu.memory_space<vmem>>, vector<1x32xf32>
    %4 = vector.broadcast %3 : vector<1x32xf32> to vector<32x32xf32>
    %5 = arith.addf %2, %4 : vector<32x32xf32>
    %c0_5 = arith.constant 0 : index
    %c0_6 = arith.constant 0 : index
    %6 = vector.load %arg4[%c0_5, %c0_6] : memref<32x32xf32, #tpu.memory_space<vmem>>, vector<32x32xf32>
    tpu.vector_store %arg4[%c0_5, %c0_6], %5 {strides = array<i32>} : memref<32x32xf32, #tpu.memory_space<vmem>>, vector<32x32xf32>,
    return
  }
  func.func @transform_0(%arg0: i32) -> (i32, i32) {
    %c0_i32 = arith.constant 0 : i32
    %c0_i32_0 = arith.constant 0 : i32
    return %arg0, %c0_i32 : i32, i32
  }
  func.func @transform_1(%arg0: i32) -> (i32, i32) {
    %c0_i32 = arith.constant 0 : i32
    %c0_i32_0 = arith.constant 0 : i32
    %c0_i32_1 = arith.constant 0 : i32
    return %c0_i32, %c0_i32_0 : i32, i32
  }
  func.func @transform_2(%arg0: i32) -> (i32, i32) {
    %c0_i32 = arith.constant 0 : i32
    %c0_i32_0 = arith.constant 0 : i32
    %c0_i32_1 = arith.constant 0 : i32
    return %c0_i32, %c0_i32_0 : i32, i32
  }
  func.func @transform_3(%arg0: i32) -> (i32, i32) {
    %c0_i32 = arith.constant 0 : i32
    %c0_i32_0 = arith.constant 0 : i32
    return %arg0, %c0_i32 : i32, i32
  }
}

module attributes {stable_mosaic.version = 11 : i64} {
  func.func @_ln_kernel(%arg0: i32, %arg1: memref<32x32xf32, #tpu.memory_space<vmem>>, %arg2: memref<1x32xf32, #tpu.memory_space<vmem>>, %arg3: memref<1x32xf32, #tpu.memory_space<vmem>>, %arg4: memref<32x32xf32, #tpu.memory_space<vmem>>) attributes {dimension_semantics = [#tpu.dimension_semantics<parallel>], iteration_bounds = array<i64: 1>, scalar_prefetch = 0 : i64, scratch_operands = 0 : i64, tpu.core_type = #tpu.core_type<tc>, window_params = [{transform_indices = @transform_0, window_bounds = array<i64: 32, 32>}, {pipeline_mode = #tpu.pipeline_mode<synchronous>, transform_indices = @transform_1, window_bounds = array<i64: 1, 32>}, {pipeline_mode = #tpu.pipeline_mode<synchronous>, transform_indices = @transform_2, window_bounds = array<i64: 1, 32>}, {transform_indices = @transform_3, window_bounds = array<i64: 32, 32>}]} {
    %c0 = arith.constant 0 : index
    %c0_0 = arith.constant 0 : index
    %0 = vector.load %arg1[%c0, %c0_0] : memref<32x32xf32, #tpu.memory_space<vmem>>, vector<32x32xf32>
    %cst = arith.constant dense<0.000000e+00> : vector<32xf32>
    %1 = vector.multi_reduction <add>, %0, %cst [1] : vector<32x32xf32> to vector<32xf32>
    %2 = vector.shape_cast %1 : vector<32xf32> to vector<32x1xf32>
    %cst_1 = arith.constant 3.200000e+01 : f32
    %3 = vector.broadcast %cst_1 : f32 to vector<32x1xf32>
    %4 = arith.divf %2, %3 : vector<32x1xf32>
    %5 = vector.broadcast %4 : vector<32x1xf32> to vector<32x32xf32>
    %6 = arith.subf %0, %5 : vector<32x32xf32>
    %7 = arith.mulf %6, %6 : vector<32x32xf32>
    %cst_2 = arith.constant dense<0.000000e+00> : vector<32xf32>
    %8 = vector.multi_reduction <add>, %7, %cst_2 [1] : vector<32x32xf32> to vector<32xf32>
    %9 = vector.shape_cast %8 : vector<32xf32> to vector<32x1xf32>
    %cst_3 = arith.constant 3.200000e+01 : f32
    %10 = vector.broadcast %cst_3 : f32 to vector<32x1xf32>
    %11 = arith.divf %9, %10 : vector<32x1xf32>
    %12 = vector.broadcast %4 : vector<32x1xf32> to vector<32x32xf32>
    %13 = arith.subf %0, %12 : vector<32x32xf32>
    %cst_4 = arith.constant 9.99999997E-7 : f32
    %14 = vector.broadcast %cst_4 : f32 to vector<32x1xf32>
    %15 = arith.addf %11, %14 : vector<32x1xf32>
    %16 = math.rsqrt %15 : vector<32x1xf32>
    %17 = vector.broadcast %16 : vector<32x1xf32> to vector<32x32xf32>
    %18 = arith.mulf %13, %17 : vector<32x32xf32>
    %c0_5 = arith.constant 0 : index
    %c0_6 = arith.constant 0 : index
    %19 = vector.load %arg2[%c0_5, %c0_6] : memref<1x32xf32, #tpu.memory_space<vmem>>, vector<1x32xf32>
    %20 = vector.broadcast %19 : vector<1x32xf32> to vector<32x32xf32>
    %21 = arith.mulf %18, %20 : vector<32x32xf32>
    %c0_7 = arith.constant 0 : index
    %c0_8 = arith.constant 0 : index
    %22 = vector.load %arg3[%c0_7, %c0_8] : memref<1x32xf32, #tpu.memory_space<vmem>>, vector<1x32xf32>
    %23 = vector.broadcast %22 : vector<1x32xf32> to vector<32x32xf32>
    %24 = arith.addf %21, %23 : vector<32x32xf32>
    %c0_9 = arith.constant 0 : index
    %c0_10 = arith.constant 0 : index
    %25 = vector.load %arg4[%c0_9, %c0_10] : memref<32x32xf32, #tpu.memory_space<vmem>>, vector<32x32xf32>
    tpu.vector_store %arg4[%c0_9, %c0_10], %24 {strides = array<i32>} : memref<32x32xf32, #tpu.memory_space<vmem>>, vector<32x32xf32>,
    return
  }
  func.func @transform_0(%arg0: i32) -> (i32, i32) {
    %c0_i32 = arith.constant 0 : i32
    %c0_i32_0 = arith.constant 0 : i32
    return %arg0, %c0_i32 : i32, i32
  }
  func.func @transform_1(%arg0: i32) -> (i32, i32) {
    %c0_i32 = arith.constant 0 : i32
    %c0_i32_0 = arith.constant 0 : i32
    %c0_i32_1 = arith.constant 0 : i32
    return %c0_i32, %c0_i32_0 : i32, i32
  }
  func.func @transform_2(%arg0: i32) -> (i32, i32) {
    %c0_i32 = arith.constant 0 : i32
    %c0_i32_0 = arith.constant 0 : i32
    %c0_i32_1 = arith.constant 0 : i32
    return %c0_i32, %c0_i32_0 : i32, i32
  }
  func.func @transform_3(%arg0: i32) -> (i32, i32) {
    %c0_i32 = arith.constant 0 : i32
    %c0_i32_0 = arith.constant 0 : i32
    return %arg0, %c0_i32 : i32, i32
  }
}

module attributes {stable_mosaic.version = 11 : i64} {
  func.func @_mlp_residual_ln_kernel(%arg0: i32, %arg1: memref<32x32xf32, #tpu.memory_space<vmem>>, %arg2: memref<32x32xf32, #tpu.memory_space<vmem>>, %arg3: memref<1x32xf32, #tpu.memory_space<vmem>>, %arg4: memref<1x32xf32, #tpu.memory_space<vmem>>, %arg5: memref<32x128xbf16, #tpu.memory_space<vmem>>, %arg6: memref<1x128xf32, #tpu.memory_space<vmem>>, %arg7: memref<128x32xbf16, #tpu.memory_space<vmem>>, %arg8: memref<1x32xf32, #tpu.memory_space<vmem>>, %arg9: memref<1x32xf32, #tpu.memory_space<vmem>>, %arg10: memref<1x32xf32, #tpu.memory_space<vmem>>, %arg11: memref<32x32xf32, #tpu.memory_space<vmem>>, %arg12: memref<32x32xf32, #tpu.memory_space<vmem>>) attributes {dimension_semantics = [#tpu.dimension_semantics<parallel>], iteration_bounds = array<i64: 1>, scalar_prefetch = 0 : i64, scratch_operands = 0 : i64, tpu.core_type = #tpu.core_type<tc>, window_params = [{transform_indices = @transform_0, window_bounds = array<i64: 32, 32>}, {transform_indices = @transform_1, window_bounds = array<i64: 32, 32>}, {pipeline_mode = #tpu.pipeline_mode<synchronous>, transform_indices = @transform_2, window_bounds = array<i64: 1, 32>}, {pipeline_mode = #tpu.pipeline_mode<synchronous>, transform_indices = @transform_3, window_bounds = array<i64: 1, 32>}, {pipeline_mode = #tpu.pipeline_mode<synchronous>, transform_indices = @transform_4, window_bounds = array<i64: 32, 128>}, {pipeline_mode = #tpu.pipeline_mode<synchronous>, transform_indices = @transform_5, window_bounds = array<i64: 1, 128>}, {pipeline_mode = #tpu.pipeline_mode<synchronous>, transform_indices = @transform_6, window_bounds = array<i64: 128, 32>}, {pipeline_mode = #tpu.pipeline_mode<synchronous>, transform_indices = @transform_7, window_bounds = array<i64: 1, 32>}, {pipeline_mode = #tpu.pipeline_mode<synchronous>, transform_indices = @transform_8, window_bounds = array<i64: 1, 32>}, {pipeline_mode = #tpu.pipeline_mode<synchronous>, transform_indices = @transform_9, window_bounds = array<i64: 1, 32>}, {transform_indices = @transform_10, window_bounds = array<i64: 32, 32>}, {transform_indices = @transform_11, window_bounds = array<i64: 32, 32>}]} {
    %c0 = arith.constant 0 : index
    %c0_0 = arith.constant 0 : index
    %0 = vector.load %arg2[%c0, %c0_0] : memref<32x32xf32, #tpu.memory_space<vmem>>, vector<32x32xf32>
    %cst = arith.constant dense<0.000000e+00> : vector<32xf32>
    %1 = vector.multi_reduction <add>, %0, %cst [1] : vector<32x32xf32> to vector<32xf32>
    %2 = vector.shape_cast %1 : vector<32xf32> to vector<32x1xf32>
    %cst_1 = arith.constant 3.200000e+01 : f32
    %3 = vector.broadcast %cst_1 : f32 to vector<32x1xf32>
    %4 = arith.divf %2, %3 : vector<32x1xf32>
    %5 = vector.broadcast %4 : vector<32x1xf32> to vector<32x32xf32>
    %6 = arith.subf %0, %5 : vector<32x32xf32>
    %7 = arith.mulf %6, %6 : vector<32x32xf32>
    %cst_2 = arith.constant dense<0.000000e+00> : vector<32xf32>
    %8 = vector.multi_reduction <add>, %7, %cst_2 [1] : vector<32x32xf32> to vector<32xf32>
    %9 = vector.shape_cast %8 : vector<32xf32> to vector<32x1xf32>
    %cst_3 = arith.constant 3.200000e+01 : f32
    %10 = vector.broadcast %cst_3 : f32 to vector<32x1xf32>
    %11 = arith.divf %9, %10 : vector<32x1xf32>
    %12 = vector.broadcast %4 : vector<32x1xf32> to vector<32x32xf32>
    %13 = arith.subf %0, %12 : vector<32x32xf32>
    %cst_4 = arith.constant 9.99999997E-7 : f32
    %14 = vector.broadcast %cst_4 : f32 to vector<32x1xf32>
    %15 = arith.addf %11, %14 : vector<32x1xf32>
    %16 = math.rsqrt %15 : vector<32x1xf32>
    %17 = vector.broadcast %16 : vector<32x1xf32> to vector<32x32xf32>
    %18 = arith.mulf %13, %17 : vector<32x32xf32>
    %c0_5 = arith.constant 0 : index
    %c0_6 = arith.constant 0 : index
    %19 = vector.load %arg3[%c0_5, %c0_6] : memref<1x32xf32, #tpu.memory_space<vmem>>, vector<1x32xf32>
    %20 = vector.broadcast %19 : vector<1x32xf32> to vector<32x32xf32>
    %21 = arith.mulf %18, %20 : vector<32x32xf32>
    %c0_7 = arith.constant 0 : index
    %c0_8 = arith.constant 0 : index
    %22 = vector.load %arg4[%c0_7, %c0_8] : memref<1x32xf32, #tpu.memory_space<vmem>>, vector<1x32xf32>
    %23 = vector.broadcast %22 : vector<1x32xf32> to vector<32x32xf32>
    %24 = arith.addf %21, %23 : vector<32x32xf32>
    %25 = arith.truncf %24 : vector<32x32xf32> to vector<32x32xbf16>
    %c0_9 = arith.constant 0 : index
    %c0_10 = arith.constant 0 : index
    %26 = vector.load %arg5[%c0_9, %c0_10] : memref<32x128xbf16, #tpu.memory_space<vmem>>, vector<32x128xbf16>
    %cst_11 = arith.constant dense<0.000000e+00> : vector<32x128xf32>
    %27 = tpu.matmul %25, %26, %cst_11 {dimension_numbers = #tpu.dot_dimension_numbers<[1], [0], [0], [1], [0, 0, 1, 1], [], []>} : vector<32x32xbf16>, vector<32x128xbf16>, vector<32x128xf32> -> vector<32x128xf32>
    %c0_12 = arith.constant 0 : index
    %c0_13 = arith.constant 0 : index
    %28 = vector.load %arg6[%c0_12, %c0_13] : memref<1x128xf32, #tpu.memory_space<vmem>>, vector<1x128xf32>
    %29 = vector.broadcast %28 : vector<1x128xf32> to vector<32x128xf32>
    %30 = arith.addf %27, %29 : vector<32x128xf32>
    %31 = arith.mulf %30, %30 : vector<32x128xf32>
    %32 = arith.mulf %30, %31 : vector<32x128xf32>
    %cst_14 = arith.constant 4.471500e-02 : f32
    %33 = vector.broadcast %cst_14 : f32 to vector<32x128xf32>
    %34 = arith.mulf %33, %32 : vector<32x128xf32>
    %35 = arith.addf %30, %34 : vector<32x128xf32>
    %cst_15 = arith.constant 0.797884583 : f32
    %36 = vector.broadcast %cst_15 : f32 to vector<32x128xf32>
    %37 = arith.mulf %36, %35 : vector<32x128xf32>
    %38 = math.tanh %37 : vector<32x128xf32>
    %cst_16 = arith.constant 1.000000e+00 : f32
    %39 = vector.broadcast %cst_16 : f32 to vector<32x128xf32>
    %40 = arith.addf %39, %38 : vector<32x128xf32>
    %cst_17 = arith.constant 5.000000e-01 : f32
    %41 = vector.broadcast %cst_17 : f32 to vector<32x128xf32>
    %42 = arith.mulf %41, %40 : vector<32x128xf32>
    %43 = arith.mulf %30, %42 : vector<32x128xf32>
    %44 = arith.truncf %43 : vector<32x128xf32> to vector<32x128xbf16>
    %c0_18 = arith.constant 0 : index
    %c0_19 = arith.constant 0 : index
    %45 = vector.load %arg7[%c0_18, %c0_19] : memref<128x32xbf16, #tpu.memory_space<vmem>>, vector<128x32xbf16>
    %cst_20 = arith.constant dense<0.000000e+00> : vector<32x32xf32>
    %46 = tpu.matmul %44, %45, %cst_20 {dimension_numbers = #tpu.dot_dimension_numbers<[1], [0], [0], [1], [0, 0, 1, 1], [], []>} : vector<32x128xbf16>, vector<128x32xbf16>, vector<32x32xf32> -> vector<32x32xf32>
    %c0_21 = arith.constant 0 : index
    %c0_22 = arith.constant 0 : index
    %47 = vector.load %arg8[%c0_21, %c0_22] : memref<1x32xf32, #tpu.memory_space<vmem>>, vector<1x32xf32>
    %48 = vector.broadcast %47 : vector<1x32xf32> to vector<32x32xf32>
    %49 = arith.addf %46, %48 : vector<32x32xf32>
    %c0_23 = arith.constant 0 : index
    %c0_24 = arith.constant 0 : index
    %50 = vector.load %arg1[%c0_23, %c0_24] : memref<32x32xf32, #tpu.memory_space<vmem>>, vector<32x32xf32>
    %51 = arith.addf %50, %49 : vector<32x32xf32>
    %c0_25 = arith.constant 0 : index
    %c0_26 = arith.constant 0 : index
    %52 = vector.load %arg11[%c0_25, %c0_26] : memref<32x32xf32, #tpu.memory_space<vmem>>, vector<32x32xf32>
    tpu.vector_store %arg11[%c0_25, %c0_26], %51 {strides = array<i32>} : memref<32x32xf32, #tpu.memory_space<vmem>>, vector<32x32xf32>,
    %cst_27 = arith.constant dense<0.000000e+00> : vector<32xf32>
    %53 = vector.multi_reduction <add>, %51, %cst_27 [1] : vector<32x32xf32> to vector<32xf32>
    %54 = vector.shape_cast %53 : vector<32xf32> to vector<32x1xf32>
    %cst_28 = arith.constant 3.200000e+01 : f32
    %55 = vector.broadcast %cst_28 : f32 to vector<32x1xf32>
    %56 = arith.divf %54, %55 : vector<32x1xf32>
    %57 = vector.broadcast %56 : vector<32x1xf32> to vector<32x32xf32>
    %58 = arith.subf %51, %57 : vector<32x32xf32>
    %59 = arith.mulf %58, %58 : vector<32x32xf32>
    %cst_29 = arith.constant dense<0.000000e+00> : vector<32xf32>
    %60 = vector.multi_reduction <add>, %59, %cst_29 [1] : vector<32x32xf32> to vector<32xf32>
    %61 = vector.shape_cast %60 : vector<32xf32> to vector<32x1xf32>
    %cst_30 = arith.constant 3.200000e+01 : f32
    %62 = vector.broadcast %cst_30 : f32 to vector<32x1xf32>
    %63 = arith.divf %61, %62 : vector<32x1xf32>
    %64 = vector.broadcast %56 : vector<32x1xf32> to vector<32x32xf32>
    %65 = arith.subf %51, %64 : vector<32x32xf32>
    %cst_31 = arith.constant 9.99999997E-7 : f32
    %66 = vector.broadcast %cst_31 : f32 to vector<32x1xf32>
    %67 = arith.addf %63, %66 : vector<32x1xf32>
    %68 = math.rsqrt %67 : vector<32x1xf32>
    %69 = vector.broadcast %68 : vector<32x1xf32> to vector<32x32xf32>
    %70 = arith.mulf %65, %69 : vector<32x32xf32>
    %c0_32 = arith.constant 0 : index
    %c0_33 = arith.constant 0 : index
    %71 = vector.load %arg9[%c0_32, %c0_33] : memref<1x32xf32, #tpu.memory_space<vmem>>, vector<1x32xf32>
    %72 = vector.broadcast %71 : vector<1x32xf32> to vector<32x32xf32>
    %73 = arith.mulf %70, %72 : vector<32x32xf32>
    %c0_34 = arith.constant 0 : index
    %c0_35 = arith.constant 0 : index
    %74 = vector.load %arg10[%c0_34, %c0_35] : memref<1x32xf32, #tpu.memory_space<vmem>>, vector<1x32xf32>
    %75 = vector.broadcast %74 : vector<1x32xf32> to vector<32x32xf32>
    %76 = arith.addf %73, %75 : vector<32x32xf32>
    %c0_36 = arith.constant 0 : index
    %c0_37 = arith.constant 0 : index
    %77 = vector.load %arg12[%c0_36, %c0_37] : memref<32x32xf32, #tpu.memory_space<vmem>>, vector<32x32xf32>
    tpu.vector_store %arg12[%c0_36, %c0_37], %76 {strides = array<i32>} : memref<32x32xf32, #tpu.memory_space<vmem>>, vector<32x32xf32>,
    return
  }
  func.func @transform_0(%arg0: i32) -> (i32, i32) {
    %c0_i32 = arith.constant 0 : i32
    %c0_i32_0 = arith.constant 0 : i32
    return %arg0, %c0_i32 : i32, i32
  }
  func.func @transform_1(%arg0: i32) -> (i32, i32) {
    %c0_i32 = arith.constant 0 : i32
    %c0_i32_0 = arith.constant 0 : i32
    return %arg0, %c0_i32 : i32, i32
  }
  func.func @transform_2(%arg0: i32) -> (i32, i32) {
    %c0_i32 = arith.constant 0 : i32
    %c0_i32_0 = arith.constant 0 : i32
    %c0_i32_1 = arith.constant 0 : i32
    return %c0_i32, %c0_i32_0 : i32, i32
  }
  func.func @transform_3(%arg0: i32) -> (i32, i32) {
    %c0_i32 = arith.constant 0 : i32
    %c0_i32_0 = arith.constant 0 : i32
    %c0_i32_1 = arith.constant 0 : i32
    return %c0_i32, %c0_i32_0 : i32, i32
  }
  func.func @transform_4(%arg0: i32) -> (i32, i32) {
    %c0_i32 = arith.constant 0 : i32
    %c0_i32_0 = arith.constant 0 : i32
    %c0_i32_1 = arith.constant 0 : i32
    return %c0_i32, %c0_i32_0 : i32, i32
  }
  func.func @transform_5(%arg0: i32) -> (i32, i32) {
    %c0_i32 = arith.constant 0 : i32
    %c0_i32_0 = arith.constant 0 : i32
    %c0_i32_1 = arith.constant 0 : i32
    return %c0_i32, %c0_i32_0 : i32, i32
  }
  func.func @transform_6(%arg0: i32) -> (i32, i32) {
    %c0_i32 = arith.constant 0 : i32
    %c0_i32_0 = arith.constant 0 : i32
    %c0_i32_1 = arith.constant 0 : i32
    return %c0_i32, %c0_i32_0 : i32, i32
  }
  func.func @transform_7(%arg0: i32) -> (i32, i32) {
    %c0_i32 = arith.constant 0 : i32
    %c0_i32_0 = arith.constant 0 : i32
    %c0_i32_1 = arith.constant 0 : i32
    return %c0_i32, %c0_i32_0 : i32, i32
  }
  func.func @transform_8(%arg0: i32) -> (i32, i32) {
    %c0_i32 = arith.constant 0 : i32
    %c0_i32_0 = arith.constant 0 : i32
    %c0_i32_1 = arith.constant 0 : i32
    return %c0_i32, %c0_i32_0 : i32, i32
  }
  func.func @transform_9(%arg0: i32) -> (i32, i32) {
    %c0_i32 = arith.constant 0 : i32
    %c0_i32_0 = arith.constant 0 : i32
    %c0_i32_1 = arith.constant 0 : i32
    return %c0_i32, %c0_i32_0 : i32, i32
  }
  func.func @transform_10(%arg0: i32) -> (i32, i32) {
    %c0_i32 = arith.constant 0 : i32
    %c0_i32_0 = arith.constant 0 : i32
    return %arg0, %c0_i32 : i32, i32
  }
  func.func @transform_11(%arg0: i32) -> (i32, i32) {
    %c0_i32 = arith.constant 0 : i32
    %c0_i32_0 = arith.constant 0 : i32
    return %arg0, %c0_i32 : i32, i32
  }
}

module attributes {stable_mosaic.version = 11 : i64} {
  func.func @_head_kernel(%arg0: i32, %arg1: memref<2x16x32xf32, #tpu.memory_space<vmem>>, %arg2: memref<1x32xf32, #tpu.memory_space<vmem>>, %arg3: memref<1x32xf32, #tpu.memory_space<vmem>>, %arg4: memref<1x32xf32, #tpu.memory_space<vmem>>, %arg5: memref<1x32xf32, #tpu.memory_space<vmem>>, %arg6: memref<2x32xf32, #tpu.memory_space<vmem>>, %arg7: memref<2x32xf32, #tpu.memory_space<vmem>>) attributes {dimension_semantics = [#tpu.dimension_semantics<parallel>], iteration_bounds = array<i64: 1>, scalar_prefetch = 0 : i64, scratch_operands = 0 : i64, tpu.core_type = #tpu.core_type<tc>, window_params = [{transform_indices = @transform_0, window_bounds = array<i64: 2, 16, 32>}, {pipeline_mode = #tpu.pipeline_mode<synchronous>, transform_indices = @transform_1, window_bounds = array<i64: 1, 32>}, {pipeline_mode = #tpu.pipeline_mode<synchronous>, transform_indices = @transform_2, window_bounds = array<i64: 1, 32>}, {pipeline_mode = #tpu.pipeline_mode<synchronous>, transform_indices = @transform_3, window_bounds = array<i64: 1, 32>}, {pipeline_mode = #tpu.pipeline_mode<synchronous>, transform_indices = @transform_4, window_bounds = array<i64: 1, 32>}, {transform_indices = @transform_5, window_bounds = array<i64: 2, 32>}, {transform_indices = @transform_6, window_bounds = array<i64: 2, 32>}]} {
    %c0 = arith.constant 0 : index
    %c0_0 = arith.constant 0 : index
    %c0_1 = arith.constant 0 : index
    %0 = vector.load %arg1[%c0, %c0_0, %c0_1] : memref<2x16x32xf32, #tpu.memory_space<vmem>>, vector<2x16x32xf32>
    %cst = arith.constant dense<0.000000e+00> : vector<2x32xf32>
    %1 = vector.multi_reduction <add>, %0, %cst [1] : vector<2x16x32xf32> to vector<2x32xf32>
    %cst_2 = arith.constant 1.600000e+01 : f32
    %2 = vector.broadcast %cst_2 : f32 to vector<2x32xf32>
    %3 = arith.divf %1, %2 : vector<2x32xf32>
    %c0_3 = arith.constant 0 : index
    %c0_4 = arith.constant 0 : index
    %4 = vector.load %arg6[%c0_3, %c0_4] : memref<2x32xf32, #tpu.memory_space<vmem>>, vector<2x32xf32>
    tpu.vector_store %arg6[%c0_3, %c0_4], %3 {strides = array<i32>} : memref<2x32xf32, #tpu.memory_space<vmem>>, vector<2x32xf32>,
    %c0_5 = arith.constant 0 : index
    %c0_6 = arith.constant 0 : index
    %5 = vector.load %arg4[%c0_5, %c0_6] : memref<1x32xf32, #tpu.memory_space<vmem>>, vector<1x32xf32>
    %6 = vector.broadcast %5 : vector<1x32xf32> to vector<2x32xf32>
    %7 = arith.subf %3, %6 : vector<2x32xf32>
    %c0_7 = arith.constant 0 : index
    %c0_8 = arith.constant 0 : index
    %8 = vector.load %arg5[%c0_7, %c0_8] : memref<1x32xf32, #tpu.memory_space<vmem>>, vector<1x32xf32>
    %cst_9 = arith.constant 9.99999974E-6 : f32
    %9 = vector.broadcast %cst_9 : f32 to vector<1x32xf32>
    %10 = arith.addf %8, %9 : vector<1x32xf32>
    %11 = math.rsqrt %10 : vector<1x32xf32>
    %12 = vector.broadcast %11 : vector<1x32xf32> to vector<2x32xf32>
    %13 = arith.mulf %7, %12 : vector<2x32xf32>
    %c0_10 = arith.constant 0 : index
    %c0_11 = arith.constant 0 : index
    %14 = vector.load %arg2[%c0_10, %c0_11] : memref<1x32xf32, #tpu.memory_space<vmem>>, vector<1x32xf32>
    %15 = vector.broadcast %14 : vector<1x32xf32> to vector<2x32xf32>
    %16 = arith.mulf %13, %15 : vector<2x32xf32>
    %c0_12 = arith.constant 0 : index
    %c0_13 = arith.constant 0 : index
    %17 = vector.load %arg3[%c0_12, %c0_13] : memref<1x32xf32, #tpu.memory_space<vmem>>, vector<1x32xf32>
    %18 = vector.broadcast %17 : vector<1x32xf32> to vector<2x32xf32>
    %19 = arith.addf %16, %18 : vector<2x32xf32>
    %c0_14 = arith.constant 0 : index
    %c0_15 = arith.constant 0 : index
    %20 = vector.load %arg7[%c0_14, %c0_15] : memref<2x32xf32, #tpu.memory_space<vmem>>, vector<2x32xf32>
    tpu.vector_store %arg7[%c0_14, %c0_15], %19 {strides = array<i32>} : memref<2x32xf32, #tpu.memory_space<vmem>>, vector<2x32xf32>,
    return
  }
  func.func @transform_0(%arg0: i32) -> (i32, i32, i32) {
    %c0_i32 = arith.constant 0 : i32
    %c0_i32_0 = arith.constant 0 : i32
    %c0_i32_1 = arith.constant 0 : i32
    return %arg0, %c0_i32, %c0_i32_0 : i32, i32, i32
  }
  func.func @transform_1(%arg0: i32) -> (i32, i32) {
    %c0_i32 = arith.constant 0 : i32
    %c0_i32_0 = arith.constant 0 : i32
    %c0_i32_1 = arith.constant 0 : i32
    return %c0_i32, %c0_i32_0 : i32, i32
  }
  func.func @transform_2(%arg0: i32) -> (i32, i32) {
    %c0_i32 = arith.constant 0 : i32
    %c0_i32_0 = arith.constant 0 : i32
    %c0_i32_1 = arith.constant 0 : i32
    return %c0_i32, %c0_i32_0 : i32, i32
  }
  func.func @transform_3(%arg0: i32) -> (i32, i32) {
    %c0_i32 = arith.constant 0 : i32
    %c0_i32_0 = arith.constant 0 : i32
    %c0_i32_1 = arith.constant 0 : i32
    return %c0_i32, %c0_i32_0 : i32, i32
  }
  func.func @transform_4(%arg0: i32) -> (i32, i32) {
    %c0_i32 = arith.constant 0 : i32
    %c0_i32_0 = arith.constant 0 : i32
    %c0_i32_1 = arith.constant 0 : i32
    return %c0_i32, %c0_i32_0 : i32, i32
  }
  func.func @transform_5(%arg0: i32) -> (i32, i32) {
    %c0_i32 = arith.constant 0 : i32
    %c0_i32_0 = arith.constant 0 : i32
    return %arg0, %c0_i32 : i32, i32
  }
  func.func @transform_6(%arg0: i32) -> (i32, i32) {
    %c0_i32 = arith.constant 0 : i32
    %c0_i32_0 = arith.constant 0 : i32
    return %arg0, %c0_i32 : i32, i32
  }
}

</mosaic_0001>

<bundles_post_ra>
// kernel: gfnet_reid_forward.6
= control target key start
LH: loop header
LB: loop body
LE: loop exit
PB: predicated region body
PF: predicated region fallthrough
CT: control target
= control target key end

     0   :  { %vm18_vm0 = vcmask 261120   ;;  %s174_s0 = inlined_call_operand.vmem [shape: f32[32,32], index: 0, kind: input, shape index: {}]   ;;  %s175_s1 = inlined_call_operand.vmem [shape: f32[1,32], index: 1, kind: input, shape index: {}]   ;;  %s176_s2 = inlined_call_operand.vmem [shape: f32[1,32], index: 2, kind: input, shape index: {}]   ;;  %s177_s3 = inlined_call_operand.vmem [shape: f32[32,32], index: 3, kind: output, shape index: {}]  }
   0x1   :  { %v14_v0 = vld [vmem:[%s174_s0] sm:$0xff]  ;;  %v16_v1 = vld [vmem:[%s174_s0 + $0x10] sm:$0xff]  ;;  %v15_v2 = vld [vmem:[%s174_s0 + $0x8] sm:$0xff] }
   0x2   :  { %v19_v3 = vsel %vm18_vm0, %v14_v0, 0.0  ;;  %v25_v4 = vsel %vm18_vm0, %v16_v1, 0.0  ;;  %v17_v5 = vld [vmem:[%s174_s0 + $0x18] sm:$0xff]  ;;  %v22_v6 = vsel %vm18_vm0, %v15_v2, 0.0  ;;  %v102_v41 = vld [vmem:[%s175_s1] ss:$0 sm:$0xff] }
   0x3   :  { %20 = vadd.xlane.f32.xlu0 %v19_v3  ;;  %26 = vadd.xlane.f32.xlu1 %v25_v4  ;;  %v28_v7 = vsel %vm18_vm0, %v17_v5, 0.0  ;;  %v103_v43 = vld [vmem:[%s176_s2] ss:$0 sm:$0xff] }
   0x7   :  { %23 = vadd.xlane.f32.xlu0 %v22_v6  ;;  %29 = vadd.xlane.f32.xlu1 %v28_v7 }
  0x8c   :  { %v21_v8 = vpop.xlane.xlu0 %20  ;;  %v27_v9 = vpop.xlane.xlu1 %26 }
  0x8d   :  { %v32_v10 = vmul.f32 0.03125, %v21_v8  ;;  %v34_v11 = vmul.f32 0.03125, %v27_v9 }
  0x8f   :  { %v36_v12 = vsub.f32 %v14_v0, %v32_v10  ;;  %v38_v13 = vsub.f32 %v16_v1, %v34_v11 }
  0x90   :  { %v24_v14 = vpop.xlane.xlu0 %23  ;;  %v30_v15 = vpop.xlane.xlu1 %29 }
  0x91   :  { %v33_v16 = vmul.f32 0.03125, %v24_v14  ;;  %v35_v17 = vmul.f32 0.03125, %v30_v15  ;;  %v40_v18 = vmul.f32 %v36_v12, %v36_v12  ;;  %v42_v19 = vmul.f32 %v38_v13, %v38_v13 }
  0x93   :  { %v37_v20 = vsub.f32 %v15_v2, %v33_v16  ;;  %v39_v21 = vsub.f32 %v17_v5, %v35_v17  ;;  %v44_v22 = vsel %vm18_vm0, %v40_v18, 0.0  ;;  %v50_v23 = vsel %vm18_vm0, %v42_v19, 0.0 }
  0x94   :  { %45 = vadd.xlane.f32.xlu0 %v44_v22 }
  0x95   :  { %v41_v24 = vmul.f32 %v37_v20, %v37_v20  ;;  %v43_v25 = vmul.f32 %v39_v21, %v39_v21 }
  0x97   :  { %v47_v26 = vsel %vm18_vm0, %v41_v24, 0.0  ;;  %v53_v27 = vsel %vm18_vm0, %v43_v25, 0.0 }
  0x98   :  { %51 = vadd.xlane.f32.xlu0 %v50_v23  ;;  %48 = vadd.xlane.f32.xlu1 %v47_v26 }
  0x9c   :  { %54 = vadd.xlane.f32.xlu1 %v53_v27 }
 0x11d   :  { %v46_v28 = vpop.xlane.xlu0 %45 }
 0x11e   :  { %v56_v29 = vmul.f32 0.03125, %v46_v28 }
 0x120   :  { %v60_v30 = vadd.f32 1e-06, %v56_v29 }
 0x121   :  { %v49_v31 = vpop.xlane.xlu1 %48  ;;  %v52_v32 = vpop.xlane.xlu0 %51 }
 0x122   :  { %104 = vrsqrt.f32 %v60_v30  ;;  %v57_v33 = vmul.f32 0.03125, %v49_v31  ;;  %v58_v34 = vmul.f32 0.03125, %v52_v32 }
 0x124   :  { %v61_v35 = vadd.f32 1e-06, %v57_v33  ;;  %v62_v36 = vadd.f32 1e-06, %v58_v34 }
 0x125   :  { %v55_v37 = vpop.xlane.xlu1 %54 }
 0x126   :  { %106 = vrsqrt.f32 %v61_v35  ;;  %v59_v38 = vmul.f32 0.03125, %v55_v37 }
 0x127   :  { %108 = vrsqrt.f32 %v62_v36 }
 0x128   :  { %v63_v39 = vadd.f32 1e-06, %v59_v38 }
 0x12a   :  { %110 = vrsqrt.f32 %v63_v39 }
 0x12f   :  { %v105_v40 = vpop.eup %104 }
 0x130   :  { %v68_v42 = vmul.f32 %v105_v40, %v36_v12 }
 0x132   :  { %v79_v44 = vmul.f32 %v102_v41, %v68_v42 }
 0x133   :  { %v107_v45 = vpop.eup %106 }
 0x134   :  { %v109_v46 = vpop.eup %108  ;;  %v90_v47 = vadd.f32 %v103_v43, %v79_v44  ;;  %v69_v48 = vmul.f32 %v107_v45, %v37_v20 }
 0x135   :  { %v70_v49 = vmul.f32 %v109_v46, %v38_v13 }
 0x136   :  { %94 = vst.msk [vmem:[%s177_s3] sm:$0xff] %vm18_vm0, %v90_v47  ;;  %v80_v50 = vmul.f32 %v102_v41, %v69_v48 }
 0x137   :  { %v111_v51 = vpop.eup %110  ;;  %v81_v52 = vmul.f32 %v102_v41, %v70_v49 }
 0x138   :  { %v91_v53 = vadd.f32 %v103_v43, %v80_v50  ;;  %v71_v54 = vmul.f32 %v111_v51, %v39_v21 }
 0x139   :  { %v92_v55 = vadd.f32 %v103_v43, %v81_v52 }
 0x13a   :  { %95 = vst.msk [vmem:[%s177_s3 + $0x8] sm:$0xff] %vm18_vm0, %v91_v53  ;;  %v82_v56 = vmul.f32 %v102_v41, %v71_v54 }
 0x13b   :  { %96 = vst.msk [vmem:[%s177_s3 + $0x10] sm:$0xff] %vm18_vm0, %v92_v55 }
 0x13c   :  { %v93_v57 = vadd.f32 %v103_v43, %v82_v56 }
 0x13e   :  { %97 = vst.msk [vmem:[%s177_s3 + $0x18] sm:$0xff] %vm18_vm0, %v93_v57 }

// kernel: gfnet_reid_forward.5
= control target key start
LH: loop header
LB: loop body
LE: loop exit
PB: predicated region body
PF: predicated region fallthrough
CT: control target
= control target key end

     0   :  { %vm60_vm0 = vcmask 392192   ;;  %vm116_vm1 = vcmask 261120   ;;  %s203_s1 = inlined_call_operand.vmem [shape: bf16[48,32], index: 1, kind: input, shape index: {}]   ;;  %s204_s0 = inlined_call_operand.vmem [shape: bf16[32,48], index: 0, kind: input, shape index: {}]   ;;  %s205_s2 = inlined_call_operand.vmem [shape: f32[1,32], index: 2, kind: input, shape index: {}]   ;;  %s206_s3 = inlined_call_operand.vmem [shape: f32[32,32], index: 3, kind: output, shape index: {}]  }
   0x1   :  { %v148_v0 = vld [vmem:[%s203_s1 + $0x10] sm:$0xff]   ;;  %v149_v1 = vld [vmem:[%s203_s1 + $0x8] sm:$0xff]   ;;  %v151_v2 = vld [vmem:[%s204_s0] sm:$0xff]  }
   0x2   :  { %138 = vmatprep.subr.bf16.mxu0 %v148_v0  ;;  %v150_v3 = vld [vmem:[%s203_s1] sm:$0xff]   ;;  %144 = vmatprep.mubr.msk.bf16.mxu0 %vm60_vm0, %v151_v2  ;;  %v152_v4 = vld [vmem:[%s204_s0 + $0x8] sm:$0xff]  }
   0x3   :  { %139 = vmatpush3.bf16.msra.mxu0 %v148_v0  ;;  %v125_v5 = vld [vmem:[%s205_s2] ss:$0 sm:$0xff] }
   0x4   :  { %140 = vmatprep.subr.bf16.mxu0 %v149_v1 }
   0x7   :  { %141 = vmatpush3.bf16.msra.mxu0 %v149_v1 }
   0x8   :  { %142 = vmatprep.subr.bf16.mxu0 %v150_v3 }
   0xb   :  { %143 = vmatpush3.bf16.msra.mxu0 %v150_v3 }
   0xe   :  { %145 = vmatmul.mubr.msk.bf16.vlgmr.msra.gmra.mxu0 %vm60_vm0, %v152_v4 }
  0xce   :  { %v146_v6 = vpop.f32.mrf.mxu0 }
  0xcf   :  { %v110_v7 = vadd.f32 %v146_v6, %v125_v5 }
  0xd0   :  { %v101_v8 = vpop.f32.mrf.mxu0 }
  0xd1   :  { %119 = vst.msk [vmem:[%s206_s3 + $0x10] sm:$0xff] %vm116_vm1, %v110_v7  ;;  %v102_v9 = vadd.f32 %v125_v5, %v101_v8 }
  0xd2   :  { %v147_v10 = vpop.f32.mrf.mxu0 }
  0xd3   :  { %117 = vst.msk [vmem:[%s206_s3] sm:$0xff] %vm116_vm1, %v102_v9  ;;  %v113_v11 = vadd.f32 %v147_v10, %v125_v5 }
  0xd4   :  { %v104_v12 = vpop.f32.mrf.mxu0 }
  0xd5   :  { %120 = vst.msk [vmem:[%s206_s3 + $0x18] sm:$0xff] %vm116_vm1, %v113_v11  ;;  %v105_v13 = vadd.f32 %v125_v5, %v104_v12 }
  0xd7   :  { %118 = vst.msk [vmem:[%s206_s3 + $0x8] sm:$0xff] %vm116_vm1, %v105_v13 }

// kernel: gfnet_reid_forward.9
= control target key start
LH: loop header
LB: loop body
LE: loop exit
PB: predicated region body
PF: predicated region fallthrough
CT: control target
= control target key end

     0   :  { %12 = vsyncpa [#allocation3], 0  ;;  %vm28_vm0 = vcmask 261120   ;;  %s251_s0 = inlined_call_operand.vmem [shape: f32[2,16,32], index: 0, kind: input, shape index: {}]   ;;  %s252_s1 = inlined_call_operand.vmem [shape: f32[1,32], index: 1, kind: input, shape index: {}, may-alias: {1,4}]   ;;  %s253_s2 = inlined_call_operand.vmem [shape: f32[1,32], index: 2, kind: input, shape index: {}, may-alias: {2,3}]   ;;  %s254_s3 = inlined_call_operand.vmem [shape: f32[1,32], index: 3, kind: input, shape index: {}, may-alias: {2,3}]   ;;  %s255_s4 = inlined_call_operand.vmem [shape: f32[1,32], index: 4, kind: input, shape index: {}, may-alias: {1,4}]   ;;  %s256_s5 = inlined_call_operand.hbm [shape: f32[2,32], index: 5, kind: output, shape index: {0}]   ;;  %s257_s6 = inlined_call_operand.hbm [shape: f32[2,32], index: 6, kind: output, shape index: {1}]  }
   0x1   :  { %v24_v0 = vld [vmem:[%s251_s0] sm:$0xff]  ;;  %v25_v1 = vld [vmem:[%s251_s0 + $0x8] sm:$0xff]  ;;  %v26_v2 = vld [vmem:[%s251_s0 + $0x10] sm:$0xff] }
   0x2   :  { %v27_v3 = vld [vmem:[%s251_s0 + $0x18] sm:$0xff]  ;;  %v29_v4 = vsel %vm28_vm0, %v24_v0, 0.0  ;;  %v30_v5 = vsel %vm28_vm0, %v25_v1, 0.0  ;;  %v38_v6 = vsel %vm28_vm0, %v26_v2, 0.0  ;;  %v66_v9 = vld [vmem:[%s255_s4] sm:$0x1] }
   0x3   :  { %v31_v7 = vadd.f32 %v30_v5, %v29_v4  ;;  %v39_v8 = vsel %vm28_vm0, %v27_v3, 0.0  ;;  %v67_v11 = vadd.f32 1e-05, %v66_v9 }
   0x4   :  { %v40_v10 = vadd.f32 %v39_v8, %v38_v6 }
   0x5   :  { %v32_v12 = vrot.slane %v31_v7, 4 }
   0x6   :  { %13 = vsyncpa [#allocation5], 0  ;;  %v41_v13 = vrot.slane %v40_v10, 4  ;;  %134 = vrsqrt.f32 %v67_v11  ;;  %v70_v16 = vlaneseq  ;;  %s180_s0 = smov [#allocation2]   ;;  %vm52_vm1 = vcmask 1041409  }
   0x7   :  { %v33_v14 = vadd.f32 %v32_v12, %v31_v7  ;;  %s107_s4 = sshll.u32 %s180_s0, 4  ;;  %v129_v28 = vld [vmem:[%s254_s3] ss:$0 sm:$0xff]  ;;  %vm55_vm2 = vcmask 254976   ;;  %s108_s4 = int_to_ptr.vmem [resolvable:$true] %s107_s4 }
   0x8   :  { %v42_v15 = vadd.f32 %v41_v13, %v40_v10  ;;  %v71_v21 = vshrl.u32 %v70_v16, 7  ;;  %v130_v35 = vld [vmem:[%s252_s1] ss:$0 sm:$0xff]  ;;  %s136_s11 = scalar_lea.vmem %s108_s4, 32  ;;  %p141_p1 = scmp.lt.s32.totalorder %s108_s4, %s108_s4 }
   0x9   :  { %v34_v17 = vrot.slane %v33_v14, 2  ;;  %p137_p0 = scmp.ne.s32.totalorder %s108_s4, %s136_s11  ;;  %p142_p2 = scmp.lt.s32.totalorder %s136_s11, %s136_s11 }
   0xa   :  { %v43_v18 = vrot.slane %v42_v15, 2  ;;  %v72_v26 = vsub.s32 0, %v71_v21 }
   0xb   :  { %v35_v19 = vadd.f32 %v34_v17, %v33_v14  ;;  %p143_p3 = por %p142_p2, %p141_p1 }
   0xc   :  { %v44_v20 = vadd.f32 %v43_v18, %v42_v15 }
   0xd   :  { %v36_v22 = vrot.slane %v35_v19, 1  ;;  %p144_p4 = pnand %p143_p3, %p137_p0 }
   0xe   :  { %v45_v23 = vrot.slane %v44_v20, 1 }
   0xf   :  { %v37_v24 = vadd.f32 %v36_v22, %v35_v19 }
  0x10   :  { %v46_v25 = vadd.f32 %v45_v23, %v44_v20 }
  0x11   :  { %v48_v27 = vmul.f32 0.0625, %v37_v24 }
  0x12   :  { %v49_v29 = vmul.f32 0.0625, %v46_v25 }
  0x13   :  { %v135_v30 = vpop.eup %134  ;;  %v64_v31 = vsub.f32 %v48_v27, %v129_v28 }
  0x14   :  { %v53_v32 = vsel %vm52_vm1, %v49_v29, %v48_v27  ;;  %v65_v33 = vsub.f32 %v49_v29, %v129_v28  ;;  %v73_v34 = vrot.slane %v135_v30, %v72_v26 }
  0x15   :  { %56 = vst.msk [vmem:[#allocation2] sm:$0x3] %vm55_vm2, %v53_v32 }
  0x16   :  { %v76_v36 = vmul.f32 %v73_v34, %v65_v33  ;;  %v75_v37 = vmul.f32 %v73_v34, %v64_v31 }
  0x17   :  { %147 = shalt.err (!%p144_p4)
}
  0x18   :  { %110 = dma.vmem_to_hbm [thread:$0]  %s108_s4, 32, %s256_s5, [#allocation3]   ;;  %v131_v38 = vld [vmem:[%s253_s2] ss:$0 sm:$0xff]  ;;  %v84_v39 = vmul.f32 %v130_v35, %v75_v37  ;;  %v85_v40 = vmul.f32 %v130_v35, %v76_v36 }
  0x19   :  { %s181_s1 = smov [#allocation4]  }
  0x1a   :  { %v93_v41 = vadd.f32 %v131_v38, %v84_v39  ;;  %v94_v42 = vadd.f32 %v131_v38, %v85_v40  ;;  %s117_s15 = sshll.u32 %s181_s1, 4  ;;  %s118_s15 = int_to_ptr.vmem [resolvable:$true] %s117_s15 }
  0x1b   :  { %s156_s16 = scalar_lea.vmem %s118_s15, 32  ;;  %p161_p6 = scmp.lt.s32.totalorder %s118_s15, %s118_s15 }
  0x1c   :  { %v97_v43 = vrot.slane %v94_v42, 7  ;;  %p157_p5 = scmp.ne.s32.totalorder %s118_s15, %s156_s16  ;;  %p162_p7 = scmp.lt.s32.totalorder %s156_s16, %s156_s16 }
  0x1e   :  { %v98_v44 = vsel %vm52_vm1, %v97_v43, %v93_v41  ;;  %p163_p8 = por %p162_p7, %p161_p6 }
  0x1f   :  { %100 = vst.msk [vmem:[#allocation4] sm:$0x3] %vm55_vm2, %v98_v44 }
  0x20   :  { %p164_p9 = pnand %p163_p8, %p157_p5 }
  0x22   :  { %167 = shalt.err (!%p164_p9)
}
  0x23   :  { %120 = dma.vmem_to_hbm [thread:$0]  %s118_s15, 32, %s257_s6, [#allocation5]  }
  0x24   :  { %176 = dma.done.wait [#allocation3], 32  }
  0x25   :  { %177 = vsyncadd [#allocation3], 4294967264 }
  0x26   :  { %178 = dma.done.wait [#allocation5], 32  }
  0x27   :  { %179 = vsyncadd [#allocation5], 4294967264 }
  0x28   :  { %127 = vsyncpa [#allocation3], 1 }
  0x29   :  { %128 = vsyncpa [#allocation5], 1 }

// kernel: gfnet_reid_forward.7
= control target key start
LH: loop header
LB: loop body
LE: loop exit
PB: predicated region body
PF: predicated region fallthrough
CT: control target
= control target key end

     0   :  { %vm42_vm0 = vcmask 261120   ;;  %s730_s1 = inlined_call_operand.vmem [shape: f32[32,32], index: 1, kind: input, shape index: {}]   ;;  %s731_s4 = inlined_call_operand.vmem [shape: bf16[32,128], index: 4, kind: input, shape index: {}]   ;;  %s732_s2 = inlined_call_operand.vmem [shape: f32[1,32], index: 2, kind: input, shape index: {}, may-alias: {2,8}]   ;;  %s733_s3 = inlined_call_operand.vmem [shape: f32[1,32], index: 3, kind: input, shape index: {}, may-alias: {3,7,9}]   ;;  %s734_s6 = inlined_call_operand.vmem [shape: bf16[128,32], index: 6, kind: input, shape index: {}]   ;;  %s735_s5 = inlined_call_operand.vmem [shape: f32[1,128], index: 5, kind: input, shape index: {}]   ;;  %s736_s7 = inlined_call_operand.vmem [shape: f32[1,32], index: 7, kind: input, shape index: {}, may-alias: {3,7,9}]   ;;  %s737_s0 = inlined_call_operand.vmem [shape: f32[32,32], index: 0, kind: input, shape index: {}, may-alias: {0,10}]   ;;  %s738_s10 = inlined_call_operand.vmem [shape: f32[32,32], index: 10, kind: output, shape index: {0}, may-alias: {0,10}]   ;;  %s739_s8 = inlined_call_operand.vmem [shape: f32[1,32], index: 8, kind: input, shape index: {}, may-alias: {2,8}]   ;;  %s740_s9 = inlined_call_operand.vmem [shape: f32[1,32], index: 9, kind: input, shape index: {}, may-alias: {3,7,9}]   ;;  %s741_s11 = inlined_call_operand.vmem [shape: f32[32,32], index: 11, kind: output, shape index: {1}]  }
   0x1   :  { %v38_v0 = vld [vmem:[%s730_s1] sm:$0xff]  ;;  %v40_v1 = vld [vmem:[%s730_s1 + $0x10] sm:$0xff]  ;;  %v39_v2 = vld [vmem:[%s730_s1 + $0x8] sm:$0xff] }
   0x2   :  { %v43_v3 = vsel %vm42_vm0, %v38_v0, 0.0  ;;  %v49_v4 = vsel %vm42_vm0, %v40_v1, 0.0  ;;  %v41_v5 = vld [vmem:[%s730_s1 + $0x18] sm:$0xff]  ;;  %v46_v6 = vsel %vm42_vm0, %v39_v2, 0.0  ;;  %v514_v28 = vld [vmem:[%s731_s4 + $0x8] sm:$0xff]   ;;  %v515_v29 = vld [vmem:[%s731_s4] sm:$0xff]  }
   0x3   :  { %44 = vadd.xlane.f32.xlu0 %v43_v3  ;;  %50 = vadd.xlane.f32.xlu1 %v49_v4  ;;  %v52_v7 = vsel %vm42_vm0, %v41_v5, 0.0  ;;  %v454_v44 = vld [vmem:[%s732_s2] ss:$0 sm:$0xff]  ;;  %v516_v62 = vld [vmem:[%s734_s6 + $0x38] sm:$0xff]   ;;  %v517_v63 = vld [vmem:[%s734_s6 + $0x30] sm:$0xff]  }
   0x4   :  { %486 = vmatprep.subr.bf16.mxu0 %v514_v28  ;;  %v455_v49 = vld [vmem:[%s733_s3] ss:$0 sm:$0xff]  ;;  %494 = vmatprep.subr.bf16.mxu1 %v516_v62  ;;  %v521_v3 = vld [vmem:[%s734_s6 + $0x10] sm:$0xff]   ;;  %v522_v4 = vld [vmem:[%s734_s6 + $0x8] sm:$0xff]  }
   0x5   :  { %487 = vmatpush3.bf16.msra.mxu0 %v514_v28  ;;  %495 = vmatpush3.bf16.msra.mxu1 %v516_v62  ;;  %v359_v62 = vld [vmem:[%s737_s0 + $0x18] sm:$0xff] }
   0x6   :  { %488 = vmatprep.subr.bf16.mxu0 %v515_v29  ;;  %496 = vmatprep.subr.bf16.mxu1 %v517_v63 }
   0x7   :  { %47 = vadd.xlane.f32.xlu0 %v46_v6  ;;  %53 = vadd.xlane.f32.xlu1 %v52_v7  ;;  %v456_v6 = vld [vmem:[%s735_s5] ss:$0 sm:$0xff] }
   0x9   :  { %489 = vmatpush3.bf16.msra.mxu0 %v515_v29  ;;  %497 = vmatpush3.bf16.msra.mxu1 %v517_v63 }
  0x8c   :  { %v45_v8 = vpop.xlane.xlu0 %44  ;;  %v51_v9 = vpop.xlane.xlu1 %50 }
  0x8d   :  { %v56_v10 = vmul.f32 0.03125, %v45_v8  ;;  %v58_v11 = vmul.f32 0.03125, %v51_v9 }
  0x8f   :  { %v60_v12 = vsub.f32 %v38_v0, %v56_v10  ;;  %v62_v13 = vsub.f32 %v40_v1, %v58_v11  ;;  %v518_v0 = vld [vmem:[%s734_s6 + $0x28] sm:$0xff]   ;;  %v519_v1 = vld [vmem:[%s734_s6 + $0x20] sm:$0xff]  }
  0x90   :  { %v48_v14 = vpop.xlane.xlu0 %47  ;;  %v54_v15 = vpop.xlane.xlu1 %53  ;;  %498 = vmatprep.subr.bf16.mxu1 %v518_v0 }
  0x91   :  { %v57_v16 = vmul.f32 0.03125, %v48_v14  ;;  %v59_v17 = vmul.f32 0.03125, %v54_v15  ;;  %v64_v18 = vmul.f32 %v60_v12, %v60_v12  ;;  %v66_v19 = vmul.f32 %v62_v13, %v62_v13  ;;  %499 = vmatpush3.bf16.msra.mxu1 %v518_v0 }
  0x92   :  { %500 = vmatprep.subr.bf16.mxu1 %v519_v1 }
  0x93   :  { %v61_v20 = vsub.f32 %v39_v2, %v57_v16  ;;  %v63_v21 = vsub.f32 %v41_v5, %v59_v17  ;;  %v68_v22 = vsel %vm42_vm0, %v64_v18, 0.0  ;;  %v74_v23 = vsel %vm42_vm0, %v66_v19, 0.0  ;;  %v520_v2 = vld [vmem:[%s734_s6 + $0x18] sm:$0xff]   ;;  %v523_v5 = vld [vmem:[%s734_s6] sm:$0xff]  }
  0x94   :  { %69 = vadd.xlane.f32.xlu0 %v68_v22 }
  0x95   :  { %v65_v24 = vmul.f32 %v61_v20, %v61_v20  ;;  %v67_v25 = vmul.f32 %v63_v21, %v63_v21  ;;  %501 = vmatpush3.bf16.msra.mxu1 %v519_v1 }
  0x96   :  { %502 = vmatprep.subr.bf16.mxu1 %v520_v2 }
  0x97   :  { %v71_v26 = vsel %vm42_vm0, %v65_v24, 0.0  ;;  %v77_v27 = vsel %vm42_vm0, %v67_v25, 0.0 }
  0x98   :  { %75 = vadd.xlane.f32.xlu0 %v74_v23  ;;  %72 = vadd.xlane.f32.xlu1 %v71_v26 }
  0x99   :  { %503 = vmatpush3.bf16.msra.mxu1 %v520_v2 }
  0x9a   :  { %504 = vmatprep.subr.bf16.mxu1 %v521_v3 }
  0x9c   :  { %78 = vadd.xlane.f32.xlu1 %v77_v27 }
  0x9d   :  { %505 = vmatpush3.bf16.msra.mxu1 %v521_v3 }
  0x9e   :  { %506 = vmatprep.subr.bf16.mxu1 %v522_v4 }
  0xa1   :  { %507 = vmatpush3.bf16.msra.mxu1 %v522_v4 }
  0xa2   :  { %508 = vmatprep.subr.bf16.mxu1 %v523_v5 }
  0xa5   :  { %509 = vmatpush3.bf16.msra.mxu1 %v523_v5 }
 0x11d   :  { %v70_v30 = vpop.xlane.xlu0 %69 }
 0x11e   :  { %v80_v31 = vmul.f32 0.03125, %v70_v30 }
 0x120   :  { %v84_v32 = vadd.f32 1e-06, %v80_v31 }
 0x121   :  { %v73_v33 = vpop.xlane.xlu1 %72  ;;  %v76_v34 = vpop.xlane.xlu0 %75 }
 0x122   :  { %524 = vrsqrt.f32 %v84_v32  ;;  %v81_v35 = vmul.f32 0.03125, %v73_v33  ;;  %v82_v36 = vmul.f32 0.03125, %v76_v34 }
 0x124   :  { %v85_v37 = vadd.f32 1e-06, %v81_v35  ;;  %v86_v38 = vadd.f32 1e-06, %v82_v36 }
 0x125   :  { %v79_v39 = vpop.xlane.xlu1 %78 }
 0x126   :  { %526 = vrsqrt.f32 %v85_v37  ;;  %v83_v40 = vmul.f32 0.03125, %v79_v39 }
 0x127   :  { %528 = vrsqrt.f32 %v86_v38 }
 0x128   :  { %v87_v41 = vadd.f32 1e-06, %v83_v40 }
 0x12a   :  { %530 = vrsqrt.f32 %v87_v41 }
 0x12f   :  { %v525_v42 = vpop.eup %524 }
 0x130   :  { %v92_v43 = vmul.f32 %v525_v42, %v60_v12 }
 0x132   :  { %v103_v48 = vmul.f32 %v454_v44, %v92_v43 }
 0x133   :  { %v527_v45 = vpop.eup %526 }
 0x134   :  { %v529_v46 = vpop.eup %528  ;;  %v93_v47 = vmul.f32 %v527_v45, %v61_v20  ;;  %v114_v53 = vadd.f32 %v455_v49, %v103_v48 }
 0x135   :  { %v94_v50 = vmul.f32 %v529_v46, %v62_v13 }
 0x136   :  { %v104_v51 = vmul.f32 %v454_v44, %v93_v47 }
 0x137   :  { %v531_v52 = vpop.eup %530  ;;  %v105_v56 = vmul.f32 %v454_v44, %v94_v50 }
 0x138   :  { %v115_v54 = vadd.f32 %v455_v49, %v104_v51  ;;  %v95_v55 = vmul.f32 %v531_v52, %v63_v21 }
 0x139   :  { %v116_v59 = vadd.f32 %v455_v49, %v105_v56 }
 0x13a   :  { %v118_v57 = vpack.c.bf16 %v115_v54, %v114_v53  ;;  %v106_v58 = vmul.f32 %v454_v44, %v95_v55  ;;  %v461_v53 = vld [vmem:[%s736_s7] ss:$0 sm:$0xff]  ;;  %v358_v55 = vld [vmem:[%s737_s0 + $0x10] sm:$0xff] }
 0x13c   :  { %490 = vmatprep.mubr.msk.bf16.mxu0 %vm42_vm0, %v118_v57  ;;  %v117_v60 = vadd.f32 %v455_v49, %v106_v58  ;;  %v356_v58 = vld [vmem:[%s737_s0] sm:$0xff] }
 0x13e   :  { %v119_v61 = vpack.c.bf16 %v117_v60, %v116_v59 }
 0x140   :  { %491 = vmatmul.mubr.msk.bf16.vlgmr.msra.gmra.mxu0 %vm42_vm0, %v119_v61 }
 0x200   :  { %v492_v7 = vpop.f32.mrf.mxu0 }
 0x201   :  { %v192_v8 = vadd.f32 %v492_v7, %v456_v6 }
 0x202   :  { %v183_v9 = vpop.f32.mrf.mxu0 }
 0x203   :  { %v200_v10 = vmul.f32 %v192_v8, %v192_v8  ;;  %v184_v11 = vadd.f32 %v456_v6, %v183_v9 }
 0x204   :  { %v493_v12 = vpop.f32.mrf.mxu0 }
 0x205   :  { %v204_v13 = vmul.f32 %v200_v10, %v192_v8  ;;  %v198_v14 = vmul.f32 %v184_v11, %v184_v11  ;;  %v195_v15 = vadd.f32 %v493_v12, %v456_v6 }
 0x206   :  { %v186_v16 = vpop.f32.mrf.mxu0 }
 0x207   :  { %v208_v17 = vmul.f32 0.044715, %v204_v13  ;;  %v202_v18 = vmul.f32 %v198_v14, %v184_v11  ;;  %v201_v19 = vmul.f32 %v195_v15, %v195_v15  ;;  %v187_v20 = vadd.f32 %v456_v6, %v186_v16 }
 0x209   :  { %v212_v21 = vadd.f32 %v208_v17, %v192_v8  ;;  %v206_v22 = vmul.f32 0.044715, %v202_v18  ;;  %v205_v23 = vmul.f32 %v201_v19, %v195_v15  ;;  %v199_v24 = vmul.f32 %v187_v20, %v187_v20 }
 0x20b   :  { %v216_v25 = vmul.f32 0.7978846, %v212_v21  ;;  %v210_v26 = vadd.f32 %v206_v22, %v184_v11  ;;  %v209_v27 = vmul.f32 0.044715, %v205_v23  ;;  %v203_v28 = vmul.f32 %v199_v24, %v187_v20 }
 0x20d   :  { %v213_v29 = vadd.f32 %v209_v27, %v195_v15  ;;  %v207_v30 = vmul.f32 0.044715, %v203_v28  ;;  %v214_v31 = vmul.f32 0.7978846, %v210_v26  ;;  %532 = vtanh.f32 %v216_v25 }
 0x20f   :  { %v217_v32 = vmul.f32 0.7978846, %v213_v29  ;;  %v211_v33 = vadd.f32 %v207_v30, %v187_v20  ;;  %534 = vtanh.f32 %v214_v31 }
 0x211   :  { %536 = vtanh.f32 %v217_v32  ;;  %v215_v34 = vmul.f32 0.7978846, %v211_v33 }
 0x213   :  { %538 = vtanh.f32 %v215_v34 }
 0x21a   :  { %v533_v35 = vpop.eup %532 }
 0x21b   :  { %v224_v39 = vadd.f32 1.0, %v533_v35 }
 0x21c   :  { %v535_v36 = vpop.eup %534 }
 0x21d   :  { %v222_v37 = vadd.f32 1.0, %v535_v36  ;;  %v228_v45 = vmul.f32 0.5, %v224_v39 }
 0x21e   :  { %v537_v38 = vpop.eup %536 }
 0x21f   :  { %v225_v40 = vadd.f32 1.0, %v537_v38  ;;  %v226_v43 = vmul.f32 0.5, %v222_v37  ;;  %v232_v50 = vmul.f32 %v228_v45, %v192_v8  ;;  %v471_v45 = vld [vmem:[%s740_s9] ss:$0 sm:$0xff] }
 0x220   :  { %v539_v41 = vpop.eup %538 }
 0x221   :  { %v223_v42 = vadd.f32 1.0, %v539_v41  ;;  %v229_v44 = vmul.f32 0.5, %v225_v40  ;;  %v230_v48 = vmul.f32 %v226_v43, %v184_v11  ;;  %v470_v43 = vld [vmem:[%s739_s8] ss:$0 sm:$0xff] }
 0x223   :  { %v227_v46 = vmul.f32 0.5, %v223_v42  ;;  %v233_v47 = vmul.f32 %v229_v44, %v195_v15 }
 0x225   :  { %v231_v49 = vmul.f32 %v227_v46, %v187_v20  ;;  %v235_v52 = vpack.c.bf16 %v233_v47, %v232_v50 }
 0x227   :  { %v234_v51 = vpack.c.bf16 %v231_v49, %v230_v48 }
 0x229   :  { %510 = vmatprep.mubr.bf16.mxu1 %v234_v51 }
 0x22a   :  { %511 = vmatmul.mubr.bf16.vlgmr.msra.gmra.mxu1 %v235_v52 }
 0x2ea   :  { %v512_v54 = vpop.f32.mrf.mxu1 }
 0x2eb   :  { %v350_v56 = vadd.f32 %v512_v54, %v461_v53 }
 0x2ec   :  { %v341_v57 = vpop.f32.mrf.mxu1 }
 0x2ed   :  { %v362_v59 = vadd.f32 %v358_v55, %v350_v56  ;;  %v342_v60 = vadd.f32 %v461_v53, %v341_v57 }
 0x2ee   :  { %v513_v61 = vpop.f32.mrf.mxu1 }
 0x2ef   :  { %366 = vst.msk [vmem:[%s738_s10 + $0x10] sm:$0xff] %vm42_vm0, %v362_v59  ;;  %v360_v63 = vadd.f32 %v356_v58, %v342_v60  ;;  %v353_v0 = vadd.f32 %v513_v61, %v461_v53  ;;  %v374_v8 = vsel %vm42_vm0, %v362_v59, 0.0 }
 0x2f0   :  { %v344_v1 = vpop.f32.mrf.mxu1 }
 0x2f1   :  { %v363_v3 = vadd.f32 %v359_v62, %v353_v0  ;;  %v345_v4 = vadd.f32 %v461_v53, %v344_v1  ;;  %v368_v5 = vsel %vm42_vm0, %v360_v63, 0.0 }
 0x2f2   :  { %369 = vadd.xlane.f32.xlu0 %v368_v5 }
 0x2f3   :  { %v377_v9 = vsel %vm42_vm0, %v363_v3, 0.0 }
 0x2f6   :  { %v357_v2 = vld [vmem:[%s737_s0 + $0x8] sm:$0xff]  ;;  %375 = vadd.xlane.f32.xlu0 %v374_v8 }
 0x2f7   :  { %364 = vst.msk [vmem:[%s738_s10] sm:$0xff] %vm42_vm0, %v360_v63  ;;  %367 = vst.msk [vmem:[%s738_s10 + $0x18] sm:$0xff] %vm42_vm0, %v363_v3  ;;  %v361_v6 = vadd.f32 %v357_v2, %v345_v4 }
 0x2f9   :  { %365 = vst.msk [vmem:[%s738_s10 + $0x8] sm:$0xff] %vm42_vm0, %v361_v6  ;;  %v371_v7 = vsel %vm42_vm0, %v361_v6, 0.0 }
 0x2fa   :  { %372 = vadd.xlane.f32.xlu1 %v371_v7 }
 0x2fe   :  { %378 = vadd.xlane.f32.xlu1 %v377_v9 }
 0x37b   :  { %v370_v10 = vpop.xlane.xlu0 %369 }
 0x37c   :  { %v380_v11 = vmul.f32 0.03125, %v370_v10 }
 0x37e   :  { %v384_v12 = vsub.f32 %v360_v63, %v380_v11 }
 0x37f   :  { %v376_v14 = vpop.xlane.xlu0 %375 }
 0x380   :  { %v382_v16 = vmul.f32 0.03125, %v376_v14  ;;  %v388_v17 = vmul.f32 %v384_v12, %v384_v12 }
 0x382   :  { %v386_v19 = vsub.f32 %v362_v59, %v382_v16  ;;  %v392_v20 = vsel %vm42_vm0, %v388_v17, 0.0 }
 0x383   :  { %v373_v13 = vpop.xlane.xlu1 %372  ;;  %393 = vadd.xlane.f32.xlu0 %v392_v20 }
 0x384   :  { %v381_v15 = vmul.f32 0.03125, %v373_v13  ;;  %v390_v24 = vmul.f32 %v386_v19, %v386_v19 }
 0x386   :  { %v385_v18 = vsub.f32 %v361_v6, %v381_v15  ;;  %v398_v27 = vsel %vm42_vm0, %v390_v24, 0.0 }
 0x387   :  { %v379_v21 = vpop.xlane.xlu1 %378  ;;  %399 = vadd.xlane.f32.xlu0 %v398_v27 }
 0x388   :  { %v383_v22 = vmul.f32 0.03125, %v379_v21  ;;  %v389_v23 = vmul.f32 %v385_v18, %v385_v18 }
 0x38a   :  { %v387_v25 = vsub.f32 %v363_v3, %v383_v22  ;;  %v395_v26 = vsel %vm42_vm0, %v389_v23, 0.0 }
 0x38b   :  { %396 = vadd.xlane.f32.xlu1 %v395_v26 }
 0x38c   :  { %v391_v28 = vmul.f32 %v387_v25, %v387_v25 }
 0x38e   :  { %v401_v29 = vsel %vm42_vm0, %v391_v28, 0.0 }
 0x38f   :  { %402 = vadd.xlane.f32.xlu1 %v401_v29 }
 0x40c   :  { %v394_v30 = vpop.xlane.xlu0 %393 }
 0x40d   :  { %v404_v31 = vmul.f32 0.03125, %v394_v30 }
 0x40f   :  { %v408_v32 = vadd.f32 1e-06, %v404_v31 }
 0x410   :  { %v400_v34 = vpop.xlane.xlu0 %399 }
 0x411   :  { %540 = vrsqrt.f32 %v408_v32  ;;  %v406_v36 = vmul.f32 0.03125, %v400_v34 }
 0x413   :  { %v410_v38 = vadd.f32 1e-06, %v406_v36 }
 0x414   :  { %v397_v33 = vpop.xlane.xlu1 %396 }
 0x415   :  { %v405_v35 = vmul.f32 0.03125, %v397_v33 }
 0x417   :  { %v409_v37 = vadd.f32 1e-06, %v405_v35 }
 0x418   :  { %v403_v39 = vpop.xlane.xlu1 %402 }
 0x419   :  { %542 = vrsqrt.f32 %v409_v37  ;;  %v407_v40 = vmul.f32 0.03125, %v403_v39 }
 0x41a   :  { %544 = vrsqrt.f32 %v410_v38 }
 0x41b   :  { %v411_v41 = vadd.f32 1e-06, %v407_v40 }
 0x41d   :  { %546 = vrsqrt.f32 %v411_v41 }
 0x41e   :  { %v541_v42 = vpop.eup %540 }
 0x41f   :  { %v416_v44 = vmul.f32 %v541_v42, %v384_v12 }
 0x421   :  { %v427_v46 = vmul.f32 %v470_v43, %v416_v44 }
 0x423   :  { %v438_v49 = vadd.f32 %v471_v45, %v427_v46 }
 0x425   :  { %442 = vst.msk [vmem:[%s741_s11] sm:$0xff] %vm42_vm0, %v438_v49 }
 0x426   :  { %v543_v47 = vpop.eup %542 }
 0x427   :  { %v545_v48 = vpop.eup %544  ;;  %v417_v50 = vmul.f32 %v543_v47, %v385_v18 }
 0x428   :  { %v418_v51 = vmul.f32 %v545_v48, %v386_v19 }
 0x429   :  { %v428_v52 = vmul.f32 %v470_v43, %v417_v50 }
 0x42a   :  { %v547_v53 = vpop.eup %546  ;;  %v429_v54 = vmul.f32 %v470_v43, %v418_v51 }
 0x42b   :  { %v439_v55 = vadd.f32 %v471_v45, %v428_v52  ;;  %v419_v56 = vmul.f32 %v547_v53, %v387_v25 }
 0x42c   :  { %v440_v57 = vadd.f32 %v471_v45, %v429_v54 }
 0x42d   :  { %443 = vst.msk [vmem:[%s741_s11 + $0x8] sm:$0xff] %vm42_vm0, %v439_v55  ;;  %v430_v58 = vmul.f32 %v470_v43, %v419_v56 }
 0x42e   :  { %444 = vst.msk [vmem:[%s741_s11 + $0x10] sm:$0xff] %vm42_vm0, %v440_v57 }
 0x42f   :  { %v441_v59 = vadd.f32 %v471_v45, %v430_v58 }
 0x431   :  { %445 = vst.msk [vmem:[%s741_s11 + $0x18] sm:$0xff] %vm42_vm0, %v441_v59 }

</bundles_post_ra>
